<compile_context>
chip_gen: v7x
topology: tpu7x:2x2x1
jax: 0.10.0
libtpu: 0.0.40
codegen_flags: <defaults>
</compile_context>

<pallas_src>
import functools

import jax
import jax.numpy as jnp
from jax.experimental import pallas as pl
from jax.experimental.pallas import tpu as pltpu

_LANE = 128
_BF16_SUBLANE = 16  # a bf16 vreg tile is (16, 128)


def _round_up(n, m):
    return ((n + m - 1) // m) * m


def _pad2(a, rows, cols):
    r, c = a.shape
    if (r, c) == (rows, cols):
        return a
    return jnp.pad(a, ((0, rows - r), (0, cols - c)))


def _mlp_kernel(x_ref, w1_ref, b1_ref, w2_ref, b2_ref, w3_ref, b3_ref, o_ref):
    # In-kernel cast of x to the MXU dtype (VPU work, rides free under the MXU);
    # avoids a separate wrapper-side pad+cast HBM pass over the activations.
    x = x_ref[...].astype(w1_ref.dtype)

    # Layer 1: Linear -> Dropout(p=0) == identity -> ReLU
    h = jnp.dot(x, w1_ref[...], preferred_element_type=jnp.float32)
    h = jnp.maximum(h + b1_ref[...], 0.0)

    # Layer 2 (hidden BasicBlock): Linear -> Dropout(p=0) -> ReLU
    h = jnp.dot(h.astype(w2_ref.dtype), w2_ref[...],
                preferred_element_type=jnp.float32)
    h = jnp.maximum(h + b2_ref[...], 0.0)

    # Output head: plain Linear (no activation)
    out = jnp.dot(h.astype(w3_ref.dtype), w3_ref[...],
                  preferred_element_type=jnp.float32)
    o_ref[...] = (out + b3_ref[...]).astype(o_ref.dtype)


def prepare_params(params, *, use_bf16=True):
    """One-time prep: pad feature dims to multiples of 128 and cast weights.

    Hoisted out of the hot path so classifier_forward is a single pallas_call.
    Zero padding is semantically free: extra K rows contribute 0 to the dot,
    extra N columns are sliced off after the call.
    """
    w1, b1, w2, b2, w3, b3 = params
    input_dim, hidden_dim = w1.shape
    output_dim = w3.shape[1]
    hid_p = _round_up(hidden_dim, _LANE)
    out_p = _round_up(output_dim, _LANE)
    wdt = jnp.bfloat16 if use_bf16 else jnp.float32

    # NOTE: layer-1 K (= input_dim) is deliberately left unpadded.
    w1_p = _pad2(w1, input_dim, hid_p).astype(wdt)
    w2_p = _pad2(w2, hid_p, hid_p).astype(wdt)
    w3_p = _pad2(w3, hid_p, out_p).astype(wdt)
    b1_p = _pad2(b1, 1, hid_p).astype(jnp.float32)   # bias/ReLU stay f32 on the VPU
    b2_p = _pad2(b2, 1, hid_p).astype(jnp.float32)
    b3_p = _pad2(b3, 1, out_p).astype(jnp.float32)

    meta = dict(input_dim=input_dim, hidden_dim=hidden_dim, output_dim=output_dim,
                hid_p=hid_p, out_p=out_p, use_bf16=use_bf16)
    return (w1_p, b1_p, w2_p, b2_p, w3_p, b3_p), meta


def classifier_forward(x, padded_params, meta, *, tile_m=None):
    """3-layer MLP classifier as one Pallas kernel, tiled over the batch."""
    w1_p, b1_p, w2_p, b2_p, w3_p, b3_p = padded_params
    batch, input_dim = x.shape
    assert input_dim == meta["input_dim"]
    hid_p, out_p = meta["hid_p"], meta["out_p"]
    output_dim = meta["output_dim"]
    use_bf16 = meta["use_bf16"]

    # ---- batch tiling: multiples of 16 (full bf16 sublane tiles); >=2 grid steps
    # whenever possible so the "parallel" axis shards across v7x's 2 TensorCores
    # and BlockSpec double-buffering has something to overlap; big tiles for big
    # batches to amortize the ~0.35us per-grid-step overhead.
    if tile_m is None:
        if batch >= 4096:
            tile_m = 1024
        elif batch >= 2 * _BF16_SUBLANE:
            tile_m = min(512, _round_up(pl.cdiv(batch, 2), _BF16_SUBLANE))
        else:
            tile_m = _round_up(max(batch, 1), _BF16_SUBLANE)
    batch_p = _round_up(batch, tile_m)
    grid = (batch_p // tile_m,)

    # x stays in its original dtype and is NOT feature-padded: the block's last
    # dim equals the full array dim (legal), and the bf16 cast happens in-kernel.
    x_p = x if batch_p == batch else jnp.pad(x, ((0, batch_p - batch), (0, 0)))

    out_dtype = jnp.bfloat16 if use_bf16 else jnp.float32
    out_itemsize = 2 if use_bf16 else 4

    flops = 2 * batch_p * (input_dim * hid_p + hid_p * hid_p + hid_p * out_p)
    bytes_accessed = (x_p.size * x_p.dtype.itemsize
                      + sum(int(p.size) * p.dtype.itemsize for p in padded_params)
                      + batch_p * out_p * out_itemsize)

    # Weights/biases are tiny (~250 KB): keep them fully resident (constant block
    # index), nowhere near any generation's VMEM limit (incl. v7x 64 MiB).
    # TODO(synk): if hidden_dim ever grows large, add pipeline_mode=pl.Buffered(1)
    # on these constant-index specs (and/or tile K) to drop the redundant buffer.
    const = lambda shape: pl.BlockSpec(shape, lambda i: (0, 0))

    out_padded = pl.pallas_call(
        _mlp_kernel,
        out_shape=jax.ShapeDtypeStruct((batch_p, out_p), out_dtype),
        grid_spec=pltpu.PrefetchScalarGridSpec(
            num_scalar_prefetch=0,
            grid=grid,
            in_specs=[
                pl.BlockSpec((tile_m, input_dim), lambda i: (i, 0)),  # x tile
                const((input_dim, hid_p)),                            # W1
                const((1, hid_p)),                                    # b1
                const((hid_p, hid_p)),                                # W2
                const((1, hid_p)),                                    # b2
                const((hid_p, out_p)),                                # W3
                const((1, out_p)),                                    # b3
            ],
            out_specs=pl.BlockSpec((tile_m, out_p), lambda i: (i, 0)),
        ),
        compiler_params=pltpu.CompilerParams(
            dimension_semantics=("parallel",)),
        cost_estimate=pl.CostEstimate(
            flops=flops, transcendentals=0, bytes_accessed=bytes_accessed),
    )(x_p, w1_p, b1_p, w2_p, b2_p, w3_p, b3_p)

    # TODO(synk): downstream consumers (argmax / cross-entropy) could take the
    # padded 128-wide logits directly (masking pad columns to -inf) and skip this
    # slice entirely; kept here to preserve the module's exact output shape.
    return out_padded[:batch, :output_dim]


def init_params(key, input_dim, hidden_dim, output_dim):
    """Deterministic synthetic init (uniform, PyTorch-Linear-style fan_in scaling)."""
    ks = jax.random.split(key, 6)

    def linear(kw, kb, fan_in, fan_out):
        bound = 1.0 / jnp.sqrt(fan_in)
        # stored as [in, out] (pre-transposed relative to torch's [out, in])
        w = jax.random.uniform(kw, (fan_in, fan_out), jnp.float32, -bound, bound)
        b = jax.random.uniform(kb, (1, fan_out), jnp.float32, -bound, bound)
        return w, b

    w1, b1 = linear(ks[0], ks[1], input_dim, hidden_dim)
    w2, b2 = linear(ks[2], ks[3], hidden_dim, hidden_dim)
    w3, b3 = linear(ks[4], ks[5], hidden_dim, output_dim)
    return (w1, b1, w2, b2, w3, b3)


def reference_forward(x, params):
    w1, b1, w2, b2, w3, b3 = params
    h = jnp.maximum(x @ w1 + b1, 0.0)
    h = jnp.maximum(h @ w2 + b2, 0.0)
    return h @ w3 + b3


if __name__ == "__main__":
    # Small shapes consistent with the module defaults:
    # Classifier(input_dim=64, output_dim=41, hidden_layers=1, hidden_dim=256, dropout_p=0)
    batch, input_dim, hidden_dim, output_dim = 128, 64, 256, 41

    key = jax.random.PRNGKey(0)
    kx, kp = jax.random.split(key)
    x = jax.random.normal(kx, (batch, input_dim), jnp.float32)
    params = init_params(kp, input_dim, hidden_dim, output_dim)

    ref = reference_forward(x, params)

    # --- fast path: one-time param prep (padded + bf16), then a single pallas_call
    # per forward.  bf16 MXU inputs + bf16 output stream, f32 accumulation.
    prep_bf16, meta_bf16 = prepare_params(params, use_bf16=True)
    fwd_bf16 = jax.jit(functools.partial(classifier_forward, meta=meta_bf16))
    out = jax.block_until_ready(fwd_bf16(x, prep_bf16))
    assert out.shape == (batch, output_dim)
    assert out.dtype == jnp.bfloat16
    assert jnp.allclose(out.astype(jnp.float32), ref, atol=3e-2, rtol=3e-2), \
        "bf16 kernel mismatch vs JAX reference"

    # --- pure-f32 path is the bit-accuracy reference (bf16 is a documented
    # reduced-precision fast path, acceptable for a classifier).
    prep_f32, meta_f32 = prepare_params(params, use_bf16=False)
    fwd_f32 = jax.jit(functools.partial(classifier_forward, meta=meta_f32))
    out_f32 = jax.block_until_ready(fwd_f32(x, prep_f32))
    assert out_f32.shape == (batch, output_dim)
    assert jnp.allclose(out_f32, ref, atol=1e-4, rtol=1e-4), \
        "f32 kernel mismatch vs JAX reference"

    print("KERNEL_OK")
</pallas_src>

<mosaic_0001>
module attributes {stable_mosaic.version = 11 : i64} {
  func.func @_mlp_kernel(%arg0: i32, %arg1: memref<64x64xf32, #tpu.memory_space<vmem>>, %arg2: memref<64x256xbf16, #tpu.memory_space<vmem>>, %arg3: memref<1x256xf32, #tpu.memory_space<vmem>>, %arg4: memref<256x256xbf16, #tpu.memory_space<vmem>>, %arg5: memref<1x256xf32, #tpu.memory_space<vmem>>, %arg6: memref<256x128xbf16, #tpu.memory_space<vmem>>, %arg7: memref<1x128xf32, #tpu.memory_space<vmem>>, %arg8: memref<64x128xbf16, #tpu.memory_space<vmem>>) attributes {dimension_semantics = [#tpu.dimension_semantics<parallel>], iteration_bounds = array<i64: 2>, scalar_prefetch = 0 : i64, scratch_operands = 0 : i64, tpu.core_type = #tpu.core_type<tc>, window_params = [{transform_indices = @transform_0, window_bounds = array<i64: 64, 64>}, {pipeline_mode = #tpu.pipeline_mode<synchronous>, transform_indices = @transform_1, window_bounds = array<i64: 64, 256>}, {pipeline_mode = #tpu.pipeline_mode<synchronous>, transform_indices = @transform_2, window_bounds = array<i64: 1, 256>}, {pipeline_mode = #tpu.pipeline_mode<synchronous>, transform_indices = @transform_3, window_bounds = array<i64: 256, 256>}, {pipeline_mode = #tpu.pipeline_mode<synchronous>, transform_indices = @transform_4, window_bounds = array<i64: 1, 256>}, {pipeline_mode = #tpu.pipeline_mode<synchronous>, transform_indices = @transform_5, window_bounds = array<i64: 256, 128>}, {pipeline_mode = #tpu.pipeline_mode<synchronous>, transform_indices = @transform_6, window_bounds = array<i64: 1, 128>}, {transform_indices = @transform_7, window_bounds = array<i64: 64, 128>}]} {
    %c0 = arith.constant 0 : index
    %c0_0 = arith.constant 0 : index
    %0 = vector.load %arg1[%c0, %c0_0] : memref<64x64xf32, #tpu.memory_space<vmem>>, vector<64x64xf32>
    %1 = arith.truncf %0 : vector<64x64xf32> to vector<64x64xbf16>
    %c0_1 = arith.constant 0 : index
    %c0_2 = arith.constant 0 : index
    %2 = vector.load %arg2[%c0_1, %c0_2] : memref<64x256xbf16, #tpu.memory_space<vmem>>, vector<64x256xbf16>
    %cst = arith.constant dense<0.000000e+00> : vector<64x256xf32>
    %3 = tpu.matmul %1, %2, %cst {dimension_numbers = #tpu.dot_dimension_numbers<[1], [0], [0], [1], [0, 0, 1, 1], [], []>} : vector<64x64xbf16>, vector<64x256xbf16>, vector<64x256xf32> -> vector<64x256xf32>
    %c0_3 = arith.constant 0 : index
    %c0_4 = arith.constant 0 : index
    %4 = vector.load %arg3[%c0_3, %c0_4] : memref<1x256xf32, #tpu.memory_space<vmem>>, vector<1x256xf32>
    %5 = vector.broadcast %4 : vector<1x256xf32> to vector<64x256xf32>
    %6 = arith.addf %3, %5 : vector<64x256xf32>
    %cst_5 = arith.constant 0.000000e+00 : f32
    %7 = vector.broadcast %cst_5 : f32 to vector<64x256xf32>
    %8 = arith.maximumf %6, %7 : vector<64x256xf32>
    %9 = arith.truncf %8 : vector<64x256xf32> to vector<64x256xbf16>
    %c0_6 = arith.constant 0 : index
    %c0_7 = arith.constant 0 : index
    %10 = vector.load %arg4[%c0_6, %c0_7] : memref<256x256xbf16, #tpu.memory_space<vmem>>, vector<256x256xbf16>
    %cst_8 = arith.constant dense<0.000000e+00> : vector<64x256xf32>
    %11 = tpu.matmul %9, %10, %cst_8 {dimension_numbers = #tpu.dot_dimension_numbers<[1], [0], [0], [1], [0, 0, 1, 1], [], []>} : vector<64x256xbf16>, vector<256x256xbf16>, vector<64x256xf32> -> vector<64x256xf32>
    %c0_9 = arith.constant 0 : index
    %c0_10 = arith.constant 0 : index
    %12 = vector.load %arg5[%c0_9, %c0_10] : memref<1x256xf32, #tpu.memory_space<vmem>>, vector<1x256xf32>
    %13 = vector.broadcast %12 : vector<1x256xf32> to vector<64x256xf32>
    %14 = arith.addf %11, %13 : vector<64x256xf32>
    %cst_11 = arith.constant 0.000000e+00 : f32
    %15 = vector.broadcast %cst_11 : f32 to vector<64x256xf32>
    %16 = arith.maximumf %14, %15 : vector<64x256xf32>
    %17 = arith.truncf %16 : vector<64x256xf32> to vector<64x256xbf16>
    %c0_12 = arith.constant 0 : index
    %c0_13 = arith.constant 0 : index
    %18 = vector.load %arg6[%c0_12, %c0_13] : memref<256x128xbf16, #tpu.memory_space<vmem>>, vector<256x128xbf16>
    %cst_14 = arith.constant dense<0.000000e+00> : vector<64x128xf32>
    %19 = tpu.matmul %17, %18, %cst_14 {dimension_numbers = #tpu.dot_dimension_numbers<[1], [0], [0], [1], [0, 0, 1, 1], [], []>} : vector<64x256xbf16>, vector<256x128xbf16>, vector<64x128xf32> -> vector<64x128xf32>
    %c0_15 = arith.constant 0 : index
    %c0_16 = arith.constant 0 : index
    %20 = vector.load %arg7[%c0_15, %c0_16] : memref<1x128xf32, #tpu.memory_space<vmem>>, vector<1x128xf32>
    %21 = vector.broadcast %20 : vector<1x128xf32> to vector<64x128xf32>
    %22 = arith.addf %19, %21 : vector<64x128xf32>
    %23 = arith.truncf %22 : vector<64x128xf32> to vector<64x128xbf16>
    %c0_17 = arith.constant 0 : index
    %c0_18 = arith.constant 0 : index
    %24 = vector.load %arg8[%c0_17, %c0_18] : memref<64x128xbf16, #tpu.memory_space<vmem>>, vector<64x128xbf16>
    tpu.vector_store %arg8[%c0_17, %c0_18], %23 {strides = array<i32>} : memref<64x128xbf16, #tpu.memory_space<vmem>>, vector<64x128xbf16>,
    return
  }
  func.func @transform_0(%arg0: i32) -> (i32, i32) {
    %c0_i32 = arith.constant 0 : i32
    %c0_i32_0 = arith.constant 0 : i32
    return %arg0, %c0_i32 : i32, i32
  }
  func.func @transform_1(%arg0: i32) -> (i32, i32) {
    %c0_i32 = arith.constant 0 : i32
    %c0_i32_0 = arith.constant 0 : i32
    %c0_i32_1 = arith.constant 0 : i32
    return %c0_i32, %c0_i32_0 : i32, i32
  }
  func.func @transform_2(%arg0: i32) -> (i32, i32) {
    %c0_i32 = arith.constant 0 : i32
    %c0_i32_0 = arith.constant 0 : i32
    %c0_i32_1 = arith.constant 0 : i32
    return %c0_i32, %c0_i32_0 : i32, i32
  }
  func.func @transform_3(%arg0: i32) -> (i32, i32) {
    %c0_i32 = arith.constant 0 : i32
    %c0_i32_0 = arith.constant 0 : i32
    %c0_i32_1 = arith.constant 0 : i32
    return %c0_i32, %c0_i32_0 : i32, i32
  }
  func.func @transform_4(%arg0: i32) -> (i32, i32) {
    %c0_i32 = arith.constant 0 : i32
    %c0_i32_0 = arith.constant 0 : i32
    %c0_i32_1 = arith.constant 0 : i32
    return %c0_i32, %c0_i32_0 : i32, i32
  }
  func.func @transform_5(%arg0: i32) -> (i32, i32) {
    %c0_i32 = arith.constant 0 : i32
    %c0_i32_0 = arith.constant 0 : i32
    %c0_i32_1 = arith.constant 0 : i32
    return %c0_i32, %c0_i32_0 : i32, i32
  }
  func.func @transform_6(%arg0: i32) -> (i32, i32) {
    %c0_i32 = arith.constant 0 : i32
    %c0_i32_0 = arith.constant 0 : i32
    %c0_i32_1 = arith.constant 0 : i32
    return %c0_i32, %c0_i32_0 : i32, i32
  }
  func.func @transform_7(%arg0: i32) -> (i32, i32) {
    %c0_i32 = arith.constant 0 : i32
    %c0_i32_0 = arith.constant 0 : i32
    return %arg0, %c0_i32 : i32, i32
  }
}

</mosaic_0001>

<bundles_post_ra>
// kernel: classifier_forward.1
= control target key start
LH: loop header
LB: loop body
LE: loop exit
PB: predicated region body
PF: predicated region fallthrough
CT: control target
= control target key end

     0   :  { %12 = vsyncpa [#allocation3], 0  ;;  %s1424_s24 = smov 0   ;;  %s1604_s0 = inlined_call_operand.vmem [shape: f32[128,64], index: 0, kind: input, shape index: {}]   ;;  %s1605_s1 = inlined_call_operand.vmem [shape: bf16[64,256], index: 1, kind: input, shape index: {}]   ;;  %s1606_s2 = inlined_call_operand.vmem [shape: f32[1,256], index: 2, kind: input, shape index: {}]   ;;  %s1607_s3 = inlined_call_operand.hbm [shape: bf16[256,256], index: 3, kind: input, shape index: {}]   ;;  %s1608_s4 = inlined_call_operand.vmem [shape: f32[1,256], index: 4, kind: input, shape index: {}]   ;;  %s1609_s5 = inlined_call_operand.vmem [shape: bf16[256,128], index: 5, kind: input, shape index: {}]   ;;  %s1610_s6 = inlined_call_operand.vmem [shape: f32[1,128], index: 6, kind: input, shape index: {}]   ;;  %s1611_s7 = inlined_call_operand.vmem [shape: bf16[128,128], index: 7, kind: output, shape index: {}]  }
   0x1 LB: > { %s1089_s25 = sadd.s32 4294967295, %s1378_s24   ;;  %p1091_p0 = scmp.ge.s32.totalorder %s1378_s24, 1  ;;  %s1378_s24 = sphi %s1424_s24, %s18_s24  }
   0x2   : > { %p201_p1 = scmp.lt.s32.totalorder %s1378_s24, 3  ;;  %s1380_s26 = smov [#allocation2]  }
   0x3   : > { %s219_s27 = sshll.u32 %s1380_s26, 4  ;;  %p1438_p3 = scmp.eq.s32.totalorder %s1089_s25, 0  ;;  %s220_s27 = int_to_ptr.vmem [resolvable:$true] %s219_s27 }
   0x4   : > { %p1432_p2 = pnand %p1091_p0, %p201_p1  ;;  %s1340_s10 = scalar_lea.hbm %s1607_s3, 4096 }
   0x5   : > { %s1616_s29 = scalar_select %p1438_p3, 1, 0 }
   0x6   : > { %s1615_s28 = scalar_select %p1432_p2, 1, 0 }
   0x7   : > { %p1246_p4 = pneg %p1432_p2  ;;  %p1341_p6 = scmp.ne.s32.totalorder %s1607_s3, %s1340_s10 }
   0x8   : > { %p1347_p10 = scmp.lt.u32.totalorder %s1340_s10, %s1607_s3 }
   0x9   : > { %p1446_p5 = pnand %p1438_p3, %p1246_p4 }
   0xb   : > { %p1342_p7 = pneg %p1446_p5 }
   0xd   : > { %p1343_p8 = pnand %p1342_p7, %p1341_p6 }
   0xf   : > { %p1344_p9 = pneg %p1343_p8 }
  0x11   : > { %p1349_p11 = pnand %p1347_p10, %p1344_p9 }
  0x13   : > { %1352 = shalt.err (!%p1349_p11)
}
  0x14   : > { %s1353_s15 = scalar_lea.vmem %s220_s27, 4096  ;;  %p1361_p1 = scmp.lt.s32.totalorder %s220_s27, %s220_s27 }
  0x15   : > { %p1354_p12 = scmp.ne.s32.totalorder %s220_s27, %s1353_s15  ;;  %p1362_p4 = scmp.lt.s32.totalorder %s1353_s15, %s1353_s15 }
  0x17   : > { %p1356_p13 = pnand %p1354_p12, %p1342_p7  ;;  %p1363_p3 = por %p1362_p4, %p1361_p1 }
  0x19   : > { %p1357_p0 = pneg %p1356_p13 }
  0x1b   : > { %p1364_p2 = pnand %p1363_p3, %p1357_p0 }
  0x1d   : > { %1367 = shalt.err (!%p1364_p2)
}
  0x1e   : > { %s1381_s16 = smov 128   ;;  %s1382_s17 = smov 8  }
  0x1f   : > { %1249 = dma.hbm_to_vmem [thread:$0]  (!%p1446_p5), %s1607_s3, 4096, %s220_s27, [#allocation3], %s1381_s16, %s1381_s16, %s1382_s17  }
  0x20   : > { %p1618_p6 = scmp.ne.s32.totalorder %s1615_s28, 0 }
  0x21   : > { %p1619_p8 = scmp.ne.s32.totalorder (!%p1618_p6), %s1616_s29, 0 }
  0x22   : > { %253 = sbr.rel (%p1618_p6) target bundleno = 749 (0x2ed), region = 48 }
  0x29   : > { %1373 = dma.done.wait (%p1619_p8), [#allocation3], 4096  }
  0x2a   : > { %1375 = vsyncadd (%p1619_p8), [#allocation3], 4294963200  ;;  %s1096_s20 = sshll.u32 %s1089_s25, 3  ;;  %v1383_v0 = vmov 0   ;;  %v1264_v1 = vld [vmem:[%s1605_s1 + $0x4] ss:$8 sps:$4 sm:$0xff]  }
  0x2b   : > { %415 = vmatprep.mubr.bf16.mxu0 %v1383_v0  ;;  %p286_p2 = scmp.lt.s32.totalorder %s1096_s20, 15  ;;  %v1266_v2 = vld [vmem:[%s1605_s1] ss:$8 sps:$4 sm:$0xff]   ;;  %383 = vmatprep.subr.bf16.mxu0 %v1264_v1  ;;  %v1267_v3 = vld [vmem:[%s1605_s1 + $0x14] ss:$8 sps:$4 sm:$0xff]   ;;  %vm370_vm0 = vcmask 523264   ;;  %v320_v1 = vlaneseq }
  0x2c   : > { %384 = vmatpush1.bf16.msra.mxu0 %v1266_v2  ;;  %v1269_v4 = vld [vmem:[%s1605_s1 + $0x10] ss:$8 sps:$4 sm:$0xff]   ;;  %v1270_v5 = vld [vmem:[%s1605_s1 + $0x24] ss:$8 sps:$4 sm:$0xff]   ;;  %v1272_v6 = vld [vmem:[%s1605_s1 + $0x20] ss:$8 sps:$4 sm:$0xff]  }
  0x2d   : > { %s1621_s20 = smov (!%p286_p2, %s1096_s20), 15  ;;  %385 = vmatprep.subr.bf16.mxu0 %v1267_v3  ;;  %v1273_v7 = vld [vmem:[%s1605_s1 + $0x34] ss:$8 sps:$4 sm:$0xff]   ;;  %v1276_v8 = vld [vmem:[#allocation2 + $0x4] ss:$8 sps:$4 sm:$0xff]   ;;  %v1558_v2 = vshrl.u32 %v320_v1, 7 }
  0x2e   : > { %s1097_s9 = sshll.u32 %s1621_s20, 3  ;;  %v1275_v9 = vld [vmem:[%s1605_s1 + $0x30] ss:$8 sps:$4 sm:$0xff]   ;;  %v1278_v10 = vld [vmem:[#allocation2] ss:$8 sps:$4 sm:$0xff]   ;;  %684 = vmatprep.subr.bf16.mxu1 %v1276_v8  ;;  %s1099_s15 = sshll.u32 %s1621_s20, 2 }
  0x2f   : > { %s1502_s16 = scalar_lea.vmem %s1604_s0, %s1097_s9  ;;  %v1279_v12 = vld [vmem:[#allocation2 + $0x14] ss:$8 sps:$4 sm:$0xff]   ;;  %685 = vmatpush1.bf16.msra.mxu1 %v1278_v10  ;;  %v1281_v14 = vld [vmem:[#allocation2 + $0x10] ss:$8 sps:$4 sm:$0xff]   ;;  %v1282_v15 = vld [vmem:[#allocation2 + $0x24] ss:$8 sps:$4 sm:$0xff]   ;;  %s1595_s18 = scalar_lea.vmem %s1611_s7, %s1099_s15 }
  0x30   : > { %386 = vmatpush1.bf16.msra.mxu0 %v1269_v4  ;;  %v298_v11 = vld [vmem:[%s1502_s16] sm:$0xff]  ;;  %v299_v13 = vld [vmem:[%s1502_s16 + $0x8] sm:$0xff]  ;;  %686 = vmatprep.subr.bf16.mxu1 %v1279_v12  ;;  %v1285_v18 = vld [vmem:[#allocation2 + $0x34] ss:$8 sps:$4 sm:$0xff]   ;;  %v322_v3 = vsub.s32 0, %v1558_v2 }
  0x31   : > { %387 = vmatprep.subr.bf16.mxu0 %v1270_v5  ;;  %v306_v16 = vpack.c.bf16 %v299_v13, %v298_v11  ;;  %v1284_v17 = vld [vmem:[#allocation2 + $0x20] ss:$8 sps:$4 sm:$0xff]   ;;  %v300_v19 = vld [vmem:[%s1502_s16 + $0x10] sm:$0xff]  ;;  %v301_v20 = vld [vmem:[%s1502_s16 + $0x18] sm:$0xff]  ;;  %v326_v5 = vsub.s32 1, %v1558_v2 }
  0x32   : > { %v1287_v21 = vld [vmem:[#allocation2 + $0x30] ss:$8 sps:$4 sm:$0xff]   ;;  %v1288_v22 = vld [vmem:[#allocation2 + $0x44] ss:$8 sps:$4 sm:$0xff]   ;;  %v307_v23 = vpack.c.bf16 %v301_v20, %v300_v19  ;;  %v1290_v24 = vld [vmem:[#allocation2 + $0x40] ss:$8 sps:$4 sm:$0xff]  }
  0x33   : > { %687 = vmatpush1.bf16.msra.mxu1 %v1281_v14  ;;  %v1291_v25 = vld [vmem:[#allocation2 + $0x54] ss:$8 sps:$4 sm:$0xff]   ;;  %v302_v26 = vld [vmem:[%s1502_s16 + $0x20] sm:$0xff]  ;;  %v303_v27 = vld [vmem:[%s1502_s16 + $0x28] sm:$0xff] }
  0x34   : > { %388 = vmatpush1.bf16.msra.mxu0 %v1272_v6  ;;  %688 = vmatprep.subr.bf16.mxu1 %v1282_v15  ;;  %v1293_v28 = vld [vmem:[#allocation2 + $0x50] ss:$8 sps:$4 sm:$0xff]   ;;  %v1294_v29 = vld [vmem:[#allocation2 + $0x64] ss:$8 sps:$4 sm:$0xff]   ;;  %v1296_v30 = vld [vmem:[#allocation2 + $0x60] ss:$8 sps:$4 sm:$0xff]   ;;  %v308_v31 = vpack.c.bf16 %v303_v27, %v302_v26 }
  0x35   : > { %389 = vmatprep.subr.bf16.mxu0 %v1273_v7  ;;  %v1297_v32 = vld [vmem:[#allocation2 + $0x74] ss:$8 sps:$4 sm:$0xff]   ;;  %v1299_v35 = vld [vmem:[#allocation2 + $0x70] ss:$8 sps:$4 sm:$0xff]   ;;  %v1300_v36 = vld [vmem:[#allocation2 + $0x84] ss:$8 sps:$4 sm:$0xff]  }
  0x36   : > { %v304_v33 = vld [vmem:[%s1502_s16 + $0x30] sm:$0xff]  ;;  %v305_v34 = vld [vmem:[%s1502_s16 + $0x38] sm:$0xff]  ;;  %v1302_v38 = vld [vmem:[#allocation2 + $0x80] ss:$8 sps:$4 sm:$0xff]  }
  0x37   : > { %689 = vmatpush1.bf16.msra.mxu1 %v1284_v17  ;;  %v309_v37 = vpack.c.bf16 %v305_v34, %v304_v33  ;;  %v1303_v39 = vld [vmem:[#allocation2 + $0x94] ss:$8 sps:$4 sm:$0xff]   ;;  %v1305_v40 = vld [vmem:[#allocation2 + $0x90] ss:$8 sps:$4 sm:$0xff]   ;;  %v1306_v41 = vld [vmem:[#allocation2 + $0xa4] ss:$8 sps:$4 sm:$0xff]  }
  0x38   : > { %390 = vmatpush1.bf16.msra.mxu0 %v1275_v9  ;;  %690 = vmatprep.subr.bf16.mxu1 %v1285_v18  ;;  %v1308_v42 = vld [vmem:[#allocation2 + $0xa0] ss:$8 sps:$4 sm:$0xff]   ;;  %v1309_v43 = vld [vmem:[#allocation2 + $0xb4] ss:$8 sps:$4 sm:$0xff]   ;;  %v1311_v44 = vld [vmem:[#allocation2 + $0xb0] ss:$8 sps:$4 sm:$0xff]  }
  0x39   : > { %v1312_v45 = vld [vmem:[#allocation2 + $0xc4] ss:$8 sps:$4 sm:$0xff]   ;;  %v1314_v46 = vld [vmem:[#allocation2 + $0xc0] ss:$8 sps:$4 sm:$0xff]   ;;  %v1315_v47 = vld [vmem:[#allocation2 + $0xd4] ss:$8 sps:$4 sm:$0xff]  }
  0x3a   : > { %v1317_v48 = vld [vmem:[#allocation2 + $0xd0] ss:$8 sps:$4 sm:$0xff]   ;;  %v1318_v49 = vld [vmem:[#allocation2 + $0xe4] ss:$8 sps:$4 sm:$0xff]   ;;  %v1320_v50 = vld [vmem:[#allocation2 + $0xe0] ss:$8 sps:$4 sm:$0xff]  }
  0x3b   : > { %1108 = vmatmul.mubr.msk.bf16.vlgmr.msra.gmra.mrb[0].mxu0 %vm370_vm0, %v306_v16  ;;  %691 = vmatpush1.bf16.msra.mxu1 %v1287_v21  ;;  %v1321_v51 = vld [vmem:[#allocation2 + $0xf4] ss:$8 sps:$4 sm:$0xff]   ;;  %v1323_v52 = vld [vmem:[#allocation2 + $0xf0] ss:$8 sps:$4 sm:$0xff]   ;;  %v1324_v53 = vld [vmem:[%s1609_s5 + $0x40] sm:$0xff]  }
  0x3c   : > { %425 = vmatprep.mubr.bf16.mxu0 %v1383_v0  ;;  %692 = vmatprep.subr.bf16.mxu1 %v1288_v22  ;;  %v1325_v54 = vld [vmem:[%s1609_s5] sm:$0xff]   ;;  %v1326_v55 = vld [vmem:[%s1609_s5 + $0x48] sm:$0xff]   ;;  %v1328_v57 = vld [vmem:[%s1609_s5 + $0x50] sm:$0xff]  }
  0x3d   : > { %1202 = vmatprep.subr.bf16.mxu0 %v1324_v53  ;;  %v1327_v56 = vld [vmem:[%s1609_s5 + $0x8] sm:$0xff]   ;;  %v1329_v58 = vld [vmem:[%s1609_s5 + $0x10] sm:$0xff]   ;;  %v1330_v59 = vld [vmem:[%s1609_s5 + $0x58] sm:$0xff]  }
  0x3e   : > { %1203 = vmatpush3.bf16.msra.mxu0 %v1325_v54  ;;  %v1331_v60 = vld [vmem:[%s1609_s5 + $0x18] sm:$0xff]   ;;  %v1332_v61 = vld [vmem:[%s1609_s5 + $0x60] sm:$0xff]   ;;  %v1334_v63 = vld [vmem:[%s1609_s5 + $0x68] sm:$0xff]  }
  0x3f   : > { %693 = vmatpush1.bf16.msra.mxu1 %v1290_v24  ;;  %1204 = vmatprep.subr.bf16.mxu0 %v1326_v55  ;;  %v1333_v62 = vld [vmem:[%s1609_s5 + $0x20] sm:$0xff]   ;;  %v1337_v1 = vld [vmem:[%s1609_s5 + $0x30] sm:$0xff]  }
  0x40   : > { %694 = vmatprep.subr.bf16.mxu1 %v1291_v25  ;;  %v318_v4 = vld [vmem:[%s1606_s2] sm:$0x3] }
  0x41   : > { %v323_v6 = vrot.slane %v318_v4, %v322_v3  ;;  %v327_v7 = vrot.slane %v318_v4, %v326_v5  ;;  %v1338_v4 = vld [vmem:[%s1609_s5 + $0x78] sm:$0xff]  }
  0x42   : > { %1205 = vmatpush3.bf16.msra.mxu0 %v1327_v56 }
  0x43   : > { %1109 = vmatmul.mubr.msk.bf16.gmra.mrb[4].mxu0 %vm370_vm0, %v307_v23  ;;  %695 = vmatpush1.bf16.msra.mxu1 %v1293_v28 }
  0x44   : > { %435 = vmatprep.mubr.bf16.mxu0 %v1383_v0  ;;  %696 = vmatprep.subr.bf16.mxu1 %v1294_v29 }
  0x45   : > { %1206 = vmatprep.subr.bf16.mxu0 %v1328_v57 }
  0x46   : > { %1207 = vmatpush3.bf16.msra.mxu0 %v1329_v58 }
  0x47   : > { %697 = vmatpush1.bf16.msra.mxu1 %v1296_v30  ;;  %1208 = vmatprep.subr.bf16.mxu0 %v1330_v59 }
  0x48   : > { %698 = vmatprep.subr.bf16.mxu1 %v1297_v32 }
  0x4a   : > { %1209 = vmatpush3.bf16.msra.mxu0 %v1331_v60 }
  0x4b   : > { %1110 = vmatmul.mubr.msk.bf16.gmra.mrb[8].mxu0 %vm370_vm0, %v308_v31  ;;  %699 = vmatpush1.bf16.msra.mxu1 %v1299_v35 }
  0x4c   : > { %445 = vmatprep.mubr.bf16.mxu0 %v1383_v0  ;;  %700 = vmatprep.subr.bf16.mxu1 %v1300_v36  ;;  %v1335_v0 = vld [vmem:[%s1609_s5 + $0x28] sm:$0xff]  }
  0x4d   : > { %1210 = vmatprep.subr.bf16.mxu0 %v1332_v61 }
  0x4e   : > { %1211 = vmatpush3.bf16.msra.mxu0 %v1333_v62 }
  0x4f   : > { %701 = vmatpush1.bf16.msra.mxu1 %v1302_v38  ;;  %1212 = vmatprep.subr.bf16.mxu0 %v1334_v63 }
  0x50   : > { %702 = vmatprep.subr.bf16.mxu1 %v1303_v39 }
  0x52   : > { %1213 = vmatpush3.bf16.msra.mxu0 %v1335_v0  ;;  %v1336_v0 = vld [vmem:[%s1609_s5 + $0x70] sm:$0xff]  }
  0x53   : > { %1111 = vmatmul.mubr.msk.bf16.gmra.mrb[12].mxu0 %vm370_vm0, %v309_v37  ;;  %703 = vmatpush1.bf16.msra.mxu1 %v1305_v40 }
  0x54   : > { %704 = vmatprep.subr.bf16.mxu1 %v1306_v41  ;;  %1214 = vmatprep.subr.bf16.mxu0 %v1336_v0 }
  0x56   : > { %1215 = vmatpush3.bf16.msra.mxu0 %v1337_v1 }
  0x57   : > { %705 = vmatpush1.bf16.msra.mxu1 %v1308_v42  ;;  %1216 = vmatprep.subr.bf16.mxu0 %v1338_v4 }
  0x58   : > { %706 = vmatprep.subr.bf16.mxu1 %v1309_v43 }
  0x5b   : > { %707 = vmatpush1.bf16.msra.mxu1 %v1311_v44 }
  0x5c   : > { %708 = vmatprep.subr.bf16.mxu1 %v1312_v45 }
  0x5f   : > { %709 = vmatpush1.bf16.msra.mxu1 %v1314_v46 }
  0x60   : > { %710 = vmatprep.subr.bf16.mxu1 %v1315_v47 }
  0x63   : > { %711 = vmatpush1.bf16.msra.mxu1 %v1317_v48 }
  0x64   : > { %712 = vmatprep.subr.bf16.mxu1 %v1318_v49 }
  0x67   : > { %713 = vmatpush1.bf16.msra.mxu1 %v1320_v50 }
  0x68   : > { %714 = vmatprep.subr.bf16.mxu1 %v1321_v51 }
  0x6b   : > { %715 = vmatpush1.bf16.msra.mxu1 %v1323_v52 }
 0x10e   : > { %v417_v8 = vpop.f32.mrb[0].mxu0 }
 0x10f   : > { %v418_v9 = vadd.f32 %v417_v8, %v323_v6  ;;  %v419_v10 = vpop.f32.mrb[1].mxu0 }
 0x110   : > { %v420_v11 = vadd.f32 %v419_v10, %v327_v7  ;;  %v421_v12 = vpop.f32.mrb[2].mxu0 }
 0x111   : > { %v422_v13 = vadd.f32 %v421_v12, %v323_v6  ;;  %v423_v14 = vpop.f32.mrb[3].mxu0  ;;  %v456_v16 = vmax.f32 %v418_v9, 0.0 }
 0x112   : > { %v424_v15 = vadd.f32 %v423_v14, %v327_v7  ;;  %v457_v18 = vmax.f32 %v420_v11, 0.0 }
 0x113   : > { %v458_v17 = vmax.f32 %v422_v13, 0.0 }
 0x114   : > { %v459_v19 = vmax.f32 %v424_v15, 0.0 }
 0x115   : > { %v472_v20 = vpack.c.bf16 %v458_v17, %v456_v16 }
 0x116   : > { %v427_v21 = vpop.f32.mrb[4].mxu0  ;;  %v473_v22 = vpack.c.bf16 %v459_v19, %v457_v18 }
 0x117   : > { %v428_v23 = vadd.f32 %v427_v21, %v323_v6  ;;  %v429_v24 = vpop.f32.mrb[5].mxu0 }
 0x118   : > { %v430_v25 = vadd.f32 %v429_v24, %v327_v7  ;;  %v431_v26 = vpop.f32.mrb[6].mxu0  ;;  %716 = vmatprep.mubr.bf16.mxu1 %v473_v22 }
 0x119   : > { %v432_v27 = vadd.f32 %v431_v26, %v323_v6  ;;  %v433_v28 = vpop.f32.mrb[7].mxu0  ;;  %717 = vmatmul.mubr.bf16.vlgmr.msra.gmra.mrb[0].mxu1 %v472_v20  ;;  %v460_v30 = vmax.f32 %v428_v23, 0.0 }
 0x11a   : > { %v434_v29 = vadd.f32 %v433_v28, %v327_v7  ;;  %v461_v32 = vmax.f32 %v430_v25, 0.0 }
 0x11b   : > { %v462_v31 = vmax.f32 %v432_v27, 0.0 }
 0x11c   : > { %v463_v33 = vmax.f32 %v434_v29, 0.0 }
 0x11d   : > { %v474_v34 = vpack.c.bf16 %v462_v31, %v460_v30 }
 0x11e   : > { %v475_v35 = vpack.c.bf16 %v463_v33, %v461_v32  ;;  %v437_v36 = vpop.f32.mrb[8].mxu0 }
 0x11f   : > { %v438_v37 = vadd.f32 %v437_v36, %v323_v6  ;;  %v439_v38 = vpop.f32.mrb[9].mxu0 }
 0x120   : > { %v440_v39 = vadd.f32 %v439_v38, %v327_v7  ;;  %v441_v40 = vpop.f32.mrb[10].mxu0  ;;  %726 = vmatprep.mubr.bf16.mxu1 %v475_v35 }
 0x121   : > { %v442_v41 = vadd.f32 %v441_v40, %v323_v6  ;;  %v443_v42 = vpop.f32.mrb[11].mxu0  ;;  %727 = vmatmul.mubr.bf16.gmra.mrb[4].mxu1 %v474_v34  ;;  %v464_v44 = vmax.f32 %v438_v37, 0.0 }
 0x122   : > { %v444_v43 = vadd.f32 %v443_v42, %v327_v7  ;;  %v465_v46 = vmax.f32 %v440_v39, 0.0 }
 0x123   : > { %v466_v45 = vmax.f32 %v442_v41, 0.0 }
 0x124   : > { %v467_v47 = vmax.f32 %v444_v43, 0.0 }
 0x125   : > { %v476_v48 = vpack.c.bf16 %v466_v45, %v464_v44 }
 0x126   : > { %v477_v49 = vpack.c.bf16 %v467_v47, %v465_v46  ;;  %v447_v50 = vpop.f32.mrb[12].mxu0 }
 0x127   : > { %v448_v51 = vadd.f32 %v447_v50, %v323_v6  ;;  %v449_v52 = vpop.f32.mrb[13].mxu0 }
 0x128   : > { %v450_v53 = vadd.f32 %v449_v52, %v327_v7  ;;  %v451_v54 = vpop.f32.mrb[14].mxu0  ;;  %736 = vmatprep.mubr.bf16.mxu1 %v477_v49 }
 0x129   : > { %v452_v55 = vadd.f32 %v451_v54, %v323_v6  ;;  %v453_v56 = vpop.f32.mrb[15].mxu0  ;;  %737 = vmatmul.mubr.bf16.gmra.mrb[8].mxu1 %v476_v48  ;;  %v468_v58 = vmax.f32 %v448_v51, 0.0  ;;  %v1339_v6 = vld [vmem:[%s1609_s5 + $0x38] sm:$0xff]  }
 0x12a   : > { %v454_v57 = vadd.f32 %v453_v56, %v327_v7  ;;  %v469_v60 = vmax.f32 %v450_v53, 0.0  ;;  %1217 = vmatpush3.bf16.msra.mxu0 %v1339_v6  ;;  %v512_v7 = vld [vmem:[%s1608_s4] sm:$0x3] }
 0x12b   : > { %v470_v59 = vmax.f32 %v452_v55, 0.0  ;;  %v517_v8 = vrot.slane %v512_v7, %v322_v3  ;;  %v521_v9 = vrot.slane %v512_v7, %v326_v5  ;;  %v1144_v6 = vld [vmem:[%s1610_s6] ss:$0 sm:$0xff] }
 0x12c   : > { %v471_v61 = vmax.f32 %v454_v57, 0.0 }
 0x12d   : > { %v478_v62 = vpack.c.bf16 %v470_v59, %v468_v58 }
 0x12e   : > { %v479_v63 = vpack.c.bf16 %v471_v61, %v469_v60 }
 0x130   : > { %746 = vmatprep.mubr.bf16.mxu1 %v479_v63 }
 0x131   : > { %747 = vmatmul.mubr.bf16.gmra.mrb[12].mxu1 %v478_v62 }
 0x1ec   : > { %v718_v10 = vpop.f32.mrb[0].mxu1 }
 0x1ed   : > { %v719_v11 = vadd.f32 %v718_v10, %v517_v8  ;;  %v720_v12 = vpop.f32.mrb[1].mxu1 }
 0x1ee   : > { %v721_v13 = vadd.f32 %v720_v12, %v521_v9  ;;  %v722_v14 = vpop.f32.mrb[2].mxu1 }
 0x1ef   : > { %v723_v15 = vadd.f32 %v722_v14, %v517_v8  ;;  %v724_v16 = vpop.f32.mrb[3].mxu1  ;;  %v757_v18 = vmax.f32 %v719_v11, 0.0 }
 0x1f0   : > { %v725_v17 = vadd.f32 %v724_v16, %v521_v9  ;;  %v758_v20 = vmax.f32 %v721_v13, 0.0 }
 0x1f1   : > { %v759_v19 = vmax.f32 %v723_v15, 0.0 }
 0x1f2   : > { %v760_v21 = vmax.f32 %v725_v17, 0.0 }
 0x1f3   : > { %v773_v22 = vpack.c.bf16 %v759_v19, %v757_v18 }
 0x1f4   : > { %v774_v23 = vpack.c.bf16 %v760_v21, %v758_v20  ;;  %v728_v24 = vpop.f32.mrb[4].mxu1 }
 0x1f5   : > { %v729_v25 = vadd.f32 %v728_v24, %v517_v8  ;;  %v730_v3 = vpop.f32.mrb[5].mxu1 }
 0x1f6   : > { %v731_v26 = vadd.f32 %v730_v3, %v521_v9  ;;  %v732_v2 = vpop.f32.mrb[6].mxu1  ;;  %948 = vmatprep.mubr.bf16.mxu0 %v774_v23 }
 0x1f7   : > { %v733_v5 = vadd.f32 %v732_v2, %v517_v8  ;;  %v734_v27 = vpop.f32.mrb[7].mxu1  ;;  %949 = vmatmul.mubr.bf16.vlgmr.msra.gmra.mrb[16].mxu0 %v773_v22  ;;  %v761_v29 = vmax.f32 %v729_v25, 0.0 }
 0x1f8   : > { %v735_v28 = vadd.f32 %v734_v27, %v521_v9  ;;  %v762_v31 = vmax.f32 %v731_v26, 0.0 }
 0x1f9   : > { %v763_v30 = vmax.f32 %v733_v5, 0.0 }
 0x1fa   : > { %v764_v32 = vmax.f32 %v735_v28, 0.0 }
 0x1fb   : > { %v775_v33 = vpack.c.bf16 %v763_v30, %v761_v29 }
 0x1fc   : > { %v776_v34 = vpack.c.bf16 %v764_v32, %v762_v31  ;;  %v738_v35 = vpop.f32.mrb[8].mxu1 }
 0x1fd   : > { %v739_v36 = vadd.f32 %v738_v35, %v517_v8  ;;  %v740_v37 = vpop.f32.mrb[9].mxu1 }
 0x1fe   : > { %v741_v38 = vadd.f32 %v740_v37, %v521_v9  ;;  %v742_v39 = vpop.f32.mrb[10].mxu1  ;;  %956 = vmatprep.mubr.bf16.mxu0 %v776_v34 }
 0x1ff   : > { %v743_v40 = vadd.f32 %v742_v39, %v517_v8  ;;  %v744_v41 = vpop.f32.mrb[11].mxu1  ;;  %957 = vmatmul.mubr.bf16.gmra.mrb[20].mxu0 %v775_v33  ;;  %v765_v43 = vmax.f32 %v739_v36, 0.0 }
 0x200   : > { %v745_v42 = vadd.f32 %v744_v41, %v521_v9  ;;  %v766_v45 = vmax.f32 %v741_v38, 0.0 }
 0x201   : > { %v767_v44 = vmax.f32 %v743_v40, 0.0 }
 0x202   : > { %v768_v46 = vmax.f32 %v745_v42, 0.0 }
 0x203   : > { %v777_v47 = vpack.c.bf16 %v767_v44, %v765_v43 }
 0x204   : > { %v778_v48 = vpack.c.bf16 %v768_v46, %v766_v45  ;;  %v748_v49 = vpop.f32.mrb[12].mxu1 }
 0x205   : > { %v749_v50 = vadd.f32 %v748_v49, %v517_v8  ;;  %v750_v51 = vpop.f32.mrb[13].mxu1 }
 0x206   : > { %v751_v52 = vadd.f32 %v750_v51, %v521_v9  ;;  %v752_v53 = vpop.f32.mrb[14].mxu1  ;;  %964 = vmatprep.mubr.bf16.mxu0 %v778_v48 }
 0x207   : > { %v753_v54 = vadd.f32 %v752_v53, %v517_v8  ;;  %v754_v55 = vpop.f32.mrb[15].mxu1  ;;  %965 = vmatmul.mubr.bf16.gmra.mrb[24].mxu0 %v777_v47  ;;  %v769_v57 = vmax.f32 %v749_v50, 0.0 }
 0x208   : > { %v755_v56 = vadd.f32 %v754_v55, %v521_v9  ;;  %v770_v59 = vmax.f32 %v751_v52, 0.0 }
 0x209   : > { %v771_v58 = vmax.f32 %v753_v54, 0.0 }
 0x20a   : > { %v772_v60 = vmax.f32 %v755_v56, 0.0 }
 0x20b   : > { %v779_v61 = vpack.c.bf16 %v771_v58, %v769_v57 }
 0x20c   : > { %v780_v62 = vpack.c.bf16 %v772_v60, %v770_v59 }
 0x20e   : > { %972 = vmatprep.mubr.bf16.mxu0 %v780_v62 }
 0x20f   : > { %973 = vmatmul.mubr.bf16.gmra.mrb[28].mxu0 %v779_v61 }
 0x2ca   : > { %v1218_v63 = vpop.f32.mrb[16].mxu0 }
 0x2cb   : > { %v1219_v0 = vpop.f32.mrb[17].mxu0 }
 0x2cc   : > { %v1220_v1 = vadd.f32 %v1219_v0, %v1218_v63  ;;  %v1221_v4 = vpop.f32.mrb[18].mxu0 }
 0x2cd   : > { %v1222_v7 = vpop.f32.mrb[19].mxu0 }
 0x2ce   : > { %v1223_v8 = vadd.f32 %v1222_v7, %v1221_v4  ;;  %v951_v9 = vadd.f32 %v1220_v1, %v1144_v6 }
 0x2d0   : > { %v954_v10 = vadd.f32 %v1223_v8, %v1144_v6 }
 0x2d2   : > { %v1182_v11 = vpack.c.bf16 %v954_v10, %v951_v9  ;;  %v1224_v12 = vpop.f32.mrb[20].mxu0 }
 0x2d3   : > { %v1225_v13 = vpop.f32.mrb[21].mxu0 }
 0x2d4   : > { %1183 = vst [vmem:[%s1595_s18] sm:$0xff] %v1182_v11   ;;  %v1226_v14 = vadd.f32 %v1225_v13, %v1224_v12  ;;  %v1227_v15 = vpop.f32.mrb[22].mxu0 }
 0x2d5   : > { %v1228_v16 = vpop.f32.mrb[23].mxu0 }
 0x2d6   : > { %v1229_v17 = vadd.f32 %v1228_v16, %v1227_v15  ;;  %v959_v18 = vadd.f32 %v1226_v14, %v1144_v6 }
 0x2d8   : > { %v962_v19 = vadd.f32 %v1229_v17, %v1144_v6 }
 0x2da   : > { %v1187_v20 = vpack.c.bf16 %v962_v19, %v959_v18  ;;  %v1230_v21 = vpop.f32.mrb[24].mxu0 }
 0x2db   : > { %v1231_v22 = vpop.f32.mrb[25].mxu0 }
 0x2dc   : > { %1199 = vst [vmem:[%s1595_s18 + $0x8] sm:$0xff] %v1187_v20   ;;  %v1232_v23 = vadd.f32 %v1231_v22, %v1230_v21  ;;  %v1233_v24 = vpop.f32.mrb[26].mxu0 }
 0x2dd   : > { %v1234_v25 = vpop.f32.mrb[27].mxu0 }
 0x2de   : > { %v1235_v3 = vadd.f32 %v1234_v25, %v1233_v24  ;;  %v967_v26 = vadd.f32 %v1232_v23, %v1144_v6 }
 0x2e0   : > { %v970_v2 = vadd.f32 %v1235_v3, %v1144_v6 }
 0x2e2   : > { %v1192_v5 = vpack.c.bf16 %v970_v2, %v967_v26  ;;  %v1236_v27 = vpop.f32.mrb[28].mxu0 }
 0x2e3   : > { %v1237_v28 = vpop.f32.mrb[29].mxu0 }
 0x2e4   : > { %1200 = vst [vmem:[%s1595_s18 + $0x10] sm:$0xff] %v1192_v5   ;;  %v1238_v29 = vadd.f32 %v1237_v28, %v1236_v27  ;;  %v1239_v30 = vpop.f32.mrb[30].mxu0 }
 0x2e5   : > { %v1240_v31 = vpop.f32.mrb[31].mxu0 }
 0x2e6   : > { %v1241_v32 = vadd.f32 %v1240_v31, %v1239_v30  ;;  %v975_v33 = vadd.f32 %v1238_v29, %v1144_v6 }
 0x2e8   : > { %v978_v34 = vadd.f32 %v1241_v32, %v1144_v6 }
 0x2ea   : > { %v1197_v35 = vpack.c.bf16 %v978_v34, %v975_v33 }
 0x2ec   : > { %1201 = vst [vmem:[%s1595_s18 + $0x18] sm:$0xff] %v1197_v35  }
 0x2ed PF: > { %s18_s24 = sadd.s32 1, %s1378_s24  }
 0x2ee   : > { %p15_p3 = scmp.ge.s32.totalorder %s18_s24, 4  }
 0x2f0   :  { %17 = sbr.rel (!%p15_p3) target bundleno = 1 (0x1), region = 83 }
 0x2f7   :  { %1043 = vsyncpa [#allocation3], 1 }
 0x2f8   :  { %1045 = vsyncpa [#allocation3 + $0x1], 1 }

</bundles_post_ra>
